<compile_context>
chip_gen: v7x
topology: tpu7x:2x2x1
jax: 0.10.0
libtpu: 0.0.40
codegen_flags: <defaults>
</compile_context>

<pallas_src>
import jax
import jax.numpy as jnp
from jax.experimental import pallas as pl
from jax.experimental.pallas import tpu as pltpu


LANE = 128       # lane width: batch tile must be a multiple of this
SUBLANE = 8      # sublane width: action / state axes padded up to this
NEG_INF = -1e30  # bias for padded action rows -> exp underflows to exactly 0.0


def _round_up(n, m):
    return ((n + m - 1) // m) * m


def policy_net_kernel(xT_ref, w1T_ref, b1_ref, w2T_ref, b2_ref, outT_ref):
    """One batch tile of the policy head, fully transposed (lane = batch) layout.

    xT:   [S_pad, TB]   states, transposed; padded rows are zero
    w1T:  [H, S_pad]    fc1 weight transposed; padded columns are zero
    b1:   [H, 1]        fc1 bias column
    w2T:  [A_pad, H]    fc2 weight transposed; padded action rows are zero
    b2:   [A_pad, 1]    fc2 bias column; padded action rows are -1e30
    outT: [A_pad, TB]   softmax probs, transposed (lane-dense unmasked stores)
    """
    # ---- fc1 + ReLU: single MXU matmul (K = S_pad is tiny; MXU is otherwise
    # idle here, and this removes the old serial VALU broadcast/add chain) ----
    hT = jnp.dot(w1T_ref[...], xT_ref[...], preferred_element_type=jnp.float32)
    hT = jnp.maximum(hT + b1_ref[...], 0.0)                       # [H, TB]

    # ---- fc2: [A_pad, H] @ [H, TB]; padded action rows get -1e30 bias ----
    logitsT = jnp.dot(w2T_ref[...], hT, preferred_element_type=jnp.float32)
    logitsT = logitsT + b2_ref[...]                               # [A_pad, TB]

    # ---- stable softmax over the action axis (axis 0: only 8 sublanes) ----
    m = jnp.max(logitsT, axis=0, keepdims=True)
    e = jnp.exp(logitsT - m)                                      # padded rows -> 0.0
    denom = jnp.sum(e, axis=0, keepdims=True)
    # Reciprocal on the EUP slot; approx=False keeps the 1e-5 tolerance.
    outT_ref[...] = (e * pl.reciprocal(denom, approx=False)).astype(outT_ref.dtype)


def pack_params(w1, b1, w2, b2):
    """Pack/pad parameters ONCE (fixed across a rollout) into the transposed,
    sublane/lane-friendly layout the kernel consumes.

    w1: [S, H], b1: [H] or [1, H], w2: [H, A], b2: [A] or [1, A]
    Returns (w1T [H, S_pad], b1c [H, 1], w2T [A_pad, H], b2c [A_pad, 1]).
    """
    S, H = w1.shape
    A = w2.shape[1]
    s_pad = _round_up(S, SUBLANE)
    a_pad = _round_up(A, SUBLANE)
    w1T = jnp.zeros((H, s_pad), jnp.float32).at[:, :S].set(w1.astype(jnp.float32).T)
    b1c = jnp.reshape(b1, (H, 1)).astype(jnp.float32)
    w2T = jnp.zeros((a_pad, H), jnp.float32).at[:A, :].set(w2.astype(jnp.float32).T)
    b2c = jnp.full((a_pad, 1), NEG_INF, jnp.float32).at[:A, :].set(
        jnp.reshape(b2, (A, 1)).astype(jnp.float32))
    return w1T, b1c, w2T, b2c


def policy_net_forward(x, w1T, b1c, w2T, b2c, action_dim, *, tb=2048):
    """x: [B, S] f32 (whole rollout batch) -> probs: [B, action_dim] f32.

    One pallas_call for the entire batch; grid over batch tiles of TB states,
    weights VMEM-resident across all grid steps.
    """
    B, S = x.shape
    H, s_pad = w1T.shape
    a_pad = w2T.shape[0]

    # Batch tile: lane-dense (multiple of 128); >=512 for large batches to sit
    # near the HBM roofline, clamped down for tiny batches.  Per-tile VMEM is
    # ~(s_pad + a_pad) * TB * 4 bytes -> well under every generation's budget.
    tb_eff = min(_round_up(tb, LANE), _round_up(B, LANE))
    b_pad = _round_up(B, tb_eff)
    grid = (b_pad // tb_eff,)

    # Transpose + zero-pad the states once (tiny: B x S f32).
    xT = jnp.zeros((s_pad, b_pad), jnp.float32).at[:S, :B].set(x.astype(jnp.float32).T)

    cost = pl.CostEstimate(
        flops=2 * b_pad * (s_pad * H + H * a_pad) + 6 * b_pad * a_pad,
        transcendentals=b_pad * (a_pad + 1),  # exp + reciprocal
        bytes_accessed=4 * (xT.size + w1T.size + b1c.size + w2T.size + b2c.size
                            + a_pad * b_pad),
    )

    probsT = pl.pallas_call(
        policy_net_kernel,
        out_shape=jax.ShapeDtypeStruct((a_pad, b_pad), jnp.float32),
        grid_spec=pltpu.PrefetchScalarGridSpec(
            num_scalar_prefetch=0,
            grid=grid,
            in_specs=[
                pl.BlockSpec((s_pad, tb_eff), lambda i: (0, i)),  # x tile (streamed)
                pl.BlockSpec((H, s_pad), lambda i: (0, 0)),       # w1T (resident)
                pl.BlockSpec((H, 1), lambda i: (0, 0)),           # b1  (resident)
                pl.BlockSpec((a_pad, H), lambda i: (0, 0)),       # w2T (resident)
                pl.BlockSpec((a_pad, 1), lambda i: (0, 0)),       # b2  (resident)
            ],
            out_specs=pl.BlockSpec((a_pad, tb_eff), lambda i: (0, i)),
        ),
        compiler_params=pltpu.CompilerParams(
            # v7x: two TensorCores split the batch grid; neutral on v5e/v6e.
            dimension_semantics=("parallel",),
        ),
        cost_estimate=cost,
    )(xT, w1T, b1c, w2T, b2c)

    # TODO(synk): downstream sampling should consume probsT ([A, B], lane-dense)
    # directly, or be fused in-kernel, to avoid this extra slice/transpose op.
    return probsT[:action_dim, :B].T


def init_params(key, state_dim, hidden_dim, action_dim):
    """Deterministic init mimicking torch.nn.Linear default U(-1/sqrt(fan_in), +)."""
    k1, k2, k3, k4 = jax.random.split(key, 4)
    bound1 = 1.0 / jnp.sqrt(state_dim)
    bound2 = 1.0 / jnp.sqrt(hidden_dim)
    w1 = jax.random.uniform(k1, (state_dim, hidden_dim), jnp.float32, -bound1, bound1)
    b1 = jax.random.uniform(k2, (1, hidden_dim), jnp.float32, -bound1, bound1)
    w2 = jax.random.uniform(k3, (hidden_dim, action_dim), jnp.float32, -bound2, bound2)
    b2 = jax.random.uniform(k4, (1, action_dim), jnp.float32, -bound2, bound2)
    return w1, b1, w2, b2


def _reference(x, w1, b1, w2, b2):
    hi = jax.lax.Precision.HIGHEST
    h = jnp.maximum(jnp.dot(x, w1, precision=hi) + b1, 0.0)
    logits = jnp.dot(h, w2, precision=hi) + b2
    return jax.nn.softmax(logits, axis=1)


if __name__ == "__main__":
    # CartPole-like dims: state_dim=4, hidden_dim=128, action_dim=2.
    state_dim, hidden_dim, action_dim = 4, 128, 2

    key = jax.random.PRNGKey(0)
    k_x, k_p, k_big = jax.random.split(key, 3)
    w1, b1, w2, b2 = init_params(k_p, state_dim, hidden_dim, action_dim)
    # Pack/pad weights once (fixed across a rollout); the kernel only sees these.
    w1T, b1c, w2T, b2c = pack_params(w1, b1, w2, b2)

    # --- small per-step batch (B=8) ---
    B = 8
    x = jax.random.normal(k_x, (B, state_dim), jnp.float32)
    probs = jax.block_until_ready(
        policy_net_forward(x, w1T, b1c, w2T, b2c, action_dim))
    ref = _reference(x, w1, b1, w2, b2)
    assert probs.shape == (B, action_dim)
    assert jnp.allclose(probs, ref, atol=1e-5, rtol=1e-5)
    assert jnp.allclose(jnp.sum(probs, axis=1), 1.0, atol=1e-5)

    # --- rollout-sized batch exercising the multi-step grid + padding path ---
    B_big = 300  # not a multiple of 128: exercises batch padding + ragged slice
    x_big = jax.random.normal(k_big, (B_big, state_dim), jnp.float32)
    probs_big = jax.block_until_ready(
        policy_net_forward(x_big, w1T, b1c, w2T, b2c, action_dim, tb=128))
    ref_big = _reference(x_big, w1, b1, w2, b2)
    assert probs_big.shape == (B_big, action_dim)
    assert jnp.allclose(probs_big, ref_big, atol=1e-5, rtol=1e-5)
    assert jnp.allclose(jnp.sum(probs_big, axis=1), 1.0, atol=1e-5)

    print("KERNEL_OK")
</pallas_src>

<mosaic_0001>
module attributes {stable_mosaic.version = 11 : i64} {
  func.func @policy_net_kernel(%arg0: i32, %arg1: memref<8x128xf32, #tpu.memory_space<vmem>>, %arg2: memref<128x8xf32, #tpu.memory_space<vmem>>, %arg3: memref<128x1xf32, #tpu.memory_space<vmem>>, %arg4: memref<8x128xf32, #tpu.memory_space<vmem>>, %arg5: memref<8x1xf32, #tpu.memory_space<vmem>>, %arg6: memref<8x128xf32, #tpu.memory_space<vmem>>) attributes {dimension_semantics = [#tpu.dimension_semantics<parallel>], iteration_bounds = array<i64: 1>, scalar_prefetch = 0 : i64, scratch_operands = 0 : i64, tpu.core_type = #tpu.core_type<tc>, window_params = [{transform_indices = @transform_0, window_bounds = array<i64: 8, 128>}, {pipeline_mode = #tpu.pipeline_mode<synchronous>, transform_indices = @transform_1, window_bounds = array<i64: 128, 8>}, {pipeline_mode = #tpu.pipeline_mode<synchronous>, transform_indices = @transform_2, window_bounds = array<i64: 128, 1>}, {pipeline_mode = #tpu.pipeline_mode<synchronous>, transform_indices = @transform_3, window_bounds = array<i64: 8, 128>}, {pipeline_mode = #tpu.pipeline_mode<synchronous>, transform_indices = @transform_4, window_bounds = array<i64: 8, 1>}, {transform_indices = @transform_5, window_bounds = array<i64: 8, 128>}]} {
    %c0 = arith.constant 0 : index
    %c0_0 = arith.constant 0 : index
    %0 = vector.load %arg2[%c0, %c0_0] : memref<128x8xf32, #tpu.memory_space<vmem>>, vector<128x8xf32>
    %c0_1 = arith.constant 0 : index
    %c0_2 = arith.constant 0 : index
    %1 = vector.load %arg1[%c0_1, %c0_2] : memref<8x128xf32, #tpu.memory_space<vmem>>, vector<8x128xf32>
    %cst = arith.constant dense<0.000000e+00> : vector<128x128xf32>
    %2 = tpu.matmul %0, %1, %cst {dimension_numbers = #tpu.dot_dimension_numbers<[1], [0], [0], [1], [0, 0, 1, 1], [], []>} : vector<128x8xf32>, vector<8x128xf32>, vector<128x128xf32> -> vector<128x128xf32>
    %c0_3 = arith.constant 0 : index
    %c0_4 = arith.constant 0 : index
    %3 = vector.load %arg3[%c0_3, %c0_4] : memref<128x1xf32, #tpu.memory_space<vmem>>, vector<128x1xf32>
    %4 = vector.broadcast %3 : vector<128x1xf32> to vector<128x128xf32>
    %5 = arith.addf %2, %4 : vector<128x128xf32>
    %cst_5 = arith.constant 0.000000e+00 : f32
    %6 = vector.broadcast %cst_5 : f32 to vector<128x128xf32>
    %7 = arith.maximumf %5, %6 : vector<128x128xf32>
    %c0_6 = arith.constant 0 : index
    %c0_7 = arith.constant 0 : index
    %8 = vector.load %arg4[%c0_6, %c0_7] : memref<8x128xf32, #tpu.memory_space<vmem>>, vector<8x128xf32>
    %cst_8 = arith.constant dense<0.000000e+00> : vector<8x128xf32>
    %9 = tpu.matmul %8, %7, %cst_8 {dimension_numbers = #tpu.dot_dimension_numbers<[1], [0], [0], [1], [0, 0, 1, 1], [], []>} : vector<8x128xf32>, vector<128x128xf32>, vector<8x128xf32> -> vector<8x128xf32>
    %c0_9 = arith.constant 0 : index
    %c0_10 = arith.constant 0 : index
    %10 = vector.load %arg5[%c0_9, %c0_10] : memref<8x1xf32, #tpu.memory_space<vmem>>, vector<8x1xf32>
    %11 = vector.broadcast %10 : vector<8x1xf32> to vector<8x128xf32>
    %12 = arith.addf %9, %11 : vector<8x128xf32>
    %cst_11 = arith.constant dense<0xFF800000> : vector<128xf32>
    %13 = vector.multi_reduction <maximumf>, %12, %cst_11 [0] : vector<8x128xf32> to vector<128xf32>
    %14 = vector.shape_cast %13 : vector<128xf32> to vector<1x128xf32>
    %15 = vector.broadcast %14 : vector<1x128xf32> to vector<8x128xf32>
    %16 = arith.subf %12, %15 : vector<8x128xf32>
    %17 = math.exp %16 : vector<8x128xf32>
    %cst_12 = arith.constant dense<0.000000e+00> : vector<128xf32>
    %18 = vector.multi_reduction <add>, %17, %cst_12 [0] : vector<8x128xf32> to vector<128xf32>
    %19 = vector.shape_cast %18 : vector<128xf32> to vector<1x128xf32>
    %20 = tpu.reciprocal %19 : vector<1x128xf32> -> vector<1x128xf32>
    %21 = vector.broadcast %20 : vector<1x128xf32> to vector<8x128xf32>
    %22 = arith.mulf %17, %21 : vector<8x128xf32>
    %c0_13 = arith.constant 0 : index
    %c0_14 = arith.constant 0 : index
    %23 = vector.load %arg6[%c0_13, %c0_14] : memref<8x128xf32, #tpu.memory_space<vmem>>, vector<8x128xf32>
    tpu.vector_store %arg6[%c0_13, %c0_14], %22 {strides = array<i32>} : memref<8x128xf32, #tpu.memory_space<vmem>>, vector<8x128xf32>,
    return
  }
  func.func @transform_0(%arg0: i32) -> (i32, i32) {
    %c0_i32 = arith.constant 0 : i32
    %c0_i32_0 = arith.constant 0 : i32
    return %c0_i32, %arg0 : i32, i32
  }
  func.func @transform_1(%arg0: i32) -> (i32, i32) {
    %c0_i32 = arith.constant 0 : i32
    %c0_i32_0 = arith.constant 0 : i32
    %c0_i32_1 = arith.constant 0 : i32
    return %c0_i32, %c0_i32_0 : i32, i32
  }
  func.func @transform_2(%arg0: i32) -> (i32, i32) {
    %c0_i32 = arith.constant 0 : i32
    %c0_i32_0 = arith.constant 0 : i32
    %c0_i32_1 = arith.constant 0 : i32
    return %c0_i32, %c0_i32_0 : i32, i32
  }
  func.func @transform_3(%arg0: i32) -> (i32, i32) {
    %c0_i32 = arith.constant 0 : i32
    %c0_i32_0 = arith.constant 0 : i32
    %c0_i32_1 = arith.constant 0 : i32
    return %c0_i32, %c0_i32_0 : i32, i32
  }
  func.func @transform_4(%arg0: i32) -> (i32, i32) {
    %c0_i32 = arith.constant 0 : i32
    %c0_i32_0 = arith.constant 0 : i32
    %c0_i32_1 = arith.constant 0 : i32
    return %c0_i32, %c0_i32_0 : i32, i32
  }
  func.func @transform_5(%arg0: i32) -> (i32, i32) {
    %c0_i32 = arith.constant 0 : i32
    %c0_i32_0 = arith.constant 0 : i32
    return %c0_i32, %arg0 : i32, i32
  }
}

</mosaic_0001>

<bundles_post_ra>
// kernel: tpu_custom_call.1
= control target key start
LH: loop header
LB: loop body
LE: loop exit
PB: predicated region body
PF: predicated region fallthrough
CT: control target
= control target key end

     0   :  { %vm134_vm0 = vcmask 64512   ;;  %v623_v4 = vmov 0   ;;  %s799_s0 = inlined_call_operand.vmem [shape: f32[8,128], index: 0, kind: input, shape index: {}]   ;;  %s800_s1 = inlined_call_operand.vmem [shape: f32[128,8], index: 1, kind: input, shape index: {}]   ;;  %s801_s2 = inlined_call_operand.vmem [shape: f32[128,1], index: 2, kind: input, shape index: {}]   ;;  %s802_s3 = inlined_call_operand.vmem [shape: f32[8,128], index: 3, kind: input, shape index: {}]   ;;  %s803_s4 = inlined_call_operand.vmem [shape: f32[8,1], index: 4, kind: input, shape index: {}]   ;;  %s804_s5 = inlined_call_operand.hbm [shape: f32[8,128], index: 5, kind: output, shape index: {}]  }
   0x1   :  { %v37_v0 = vld [vmem:[%s799_s0] sm:$0xff]  ;;  %v22_v2 = vld [vmem:[%s800_s1 + $0x8] sm:$0xff]  ;;  %v23_v3 = vld [vmem:[%s800_s1 + $0x10] sm:$0xff]  ;;  %593 = vset.pattern.permute.xlu0 %v623_v4  ;;  %594 = vset.pattern.permute.xlu1 %v623_v4 }
   0x2   :  { %v21_v1 = vld [vmem:[%s800_s1] sm:$0xff]  ;;  %503 = vmatprep.subr.mxu0 %v37_v0  ;;  %v24_v5 = vld [vmem:[%s800_s1 + $0x18] sm:$0xff]  ;;  %v40_v8 = vld [vmem:[%s801_s2 + $0x10] sm:$0xff] }
   0x3   :  { %505 = vmatprep.mubr.msk.f32.mxu0 %vm134_vm0, %v21_v1  ;;  %504 = vmatpush3.msra.mxu0 %v37_v0  ;;  %v25_v6 = vld [vmem:[%s800_s1 + $0x20] sm:$0xff]  ;;  %v39_v9 = vld [vmem:[%s801_s2 + $0x8] sm:$0xff]  ;;  %v41_v11 = vld [vmem:[%s801_s2 + $0x18] sm:$0xff] }
   0x4   :  { %506 = vmatmul.mubr.msk.f32.vlgmr.msra.gmra.mrb[0].mxu0 %vm134_vm0, %v22_v2  ;;  %v38_v7 = vld [vmem:[%s801_s2] sm:$0xff]  ;;  %66 = vperm.xlu1 %594, %v40_v8   ;;  %v26_v10 = vld [vmem:[%s800_s1 + $0x28] sm:$0xff]  ;;  %v27_v12 = vld [vmem:[%s800_s1 + $0x30] sm:$0xff] }
   0x5   :  { %508 = vmatprep.mubr.msk.f32.mxu0 %vm134_vm0, %v23_v3  ;;  %56 = vperm.xlu0 %593, %v38_v7   ;;  %v42_v13 = vld [vmem:[%s801_s2 + $0x20] sm:$0xff] }
   0x8   :  { %509 = vmatmul.mubr.msk.f32.gmra.mrb[2].mxu0 %vm134_vm0, %v24_v5  ;;  %71 = vperm.xlu1 %594, %v41_v11  }
   0x9   :  { %511 = vmatprep.mubr.msk.f32.mxu0 %vm134_vm0, %v25_v6  ;;  %61 = vperm.xlu0 %593, %v39_v9  }
   0xc   :  { %512 = vmatmul.mubr.msk.f32.gmra.mrb[4].mxu0 %vm134_vm0, %v26_v10 }
   0xd   :  { %10 = vsyncpa [#allocation3], 0  ;;  %514 = vmatprep.mubr.msk.f32.mxu0 %vm134_vm0, %v27_v12  ;;  %v28_v14 = vld [vmem:[%s800_s1 + $0x38] sm:$0xff]  ;;  %v43_v15 = vld [vmem:[%s801_s2 + $0x28] sm:$0xff]  ;;  %76 = vperm.xlu0 %593, %v42_v13   ;;  %v624_v35 = vmov 0.0|0.0   ;;  %vm625_vm1 = vmmov 0  }
   0xe   :  { %v29_v16 = vld [vmem:[%s800_s1 + $0x40] sm:$0xff]  ;;  %v44_v17 = vld [vmem:[%s801_s2 + $0x30] sm:$0xff]  ;;  %81 = vperm.xlu1 %594, %v43_v15   ;;  %v30_v18 = vld [vmem:[%s800_s1 + $0x48] sm:$0xff]  ;;  %564 = vmatprep.subr.bf16.mxu1 %v624_v35  ;;  %v626_v36 = vmov 0.0  }
   0xf   :  { %v45_v19 = vld [vmem:[%s801_s2 + $0x38] sm:$0xff]  ;;  %v31_v20 = vld [vmem:[%s800_s1 + $0x50] sm:$0xff]  ;;  %v46_v21 = vld [vmem:[%s801_s2 + $0x40] sm:$0xff]  ;;  %561 = vmatprep.mubr.msk.f32.mxu1 %vm625_vm1, %v626_v36 }
  0x10   :  { %515 = vmatmul.mubr.msk.f32.gmra.mrb[6].mxu0 %vm134_vm0, %v28_v14  ;;  %v32_v22 = vld [vmem:[%s800_s1 + $0x58] sm:$0xff]  ;;  %v47_v23 = vld [vmem:[%s801_s2 + $0x48] sm:$0xff]  ;;  %v33_v24 = vld [vmem:[%s800_s1 + $0x60] sm:$0xff] }
  0x11   :  { %517 = vmatprep.mubr.msk.f32.mxu0 %vm134_vm0, %v29_v16  ;;  %86 = vperm.xlu0 %593, %v44_v17   ;;  %v48_v25 = vld [vmem:[%s801_s2 + $0x50] sm:$0xff]  ;;  %v34_v26 = vld [vmem:[%s800_s1 + $0x68] sm:$0xff]  ;;  %v49_v27 = vld [vmem:[%s801_s2 + $0x58] sm:$0xff] }
  0x12   :  { %91 = vperm.xlu1 %594, %v45_v19   ;;  %v35_v28 = vld [vmem:[%s800_s1 + $0x70] sm:$0xff]  ;;  %v50_v29 = vld [vmem:[%s801_s2 + $0x60] sm:$0xff]  ;;  %v36_v30 = vld [vmem:[%s800_s1 + $0x78] sm:$0xff] }
  0x13   :  { %v51_v31 = vld [vmem:[%s801_s2 + $0x68] sm:$0xff]  ;;  %v52_v32 = vld [vmem:[%s801_s2 + $0x70] sm:$0xff]  ;;  %v53_v33 = vld [vmem:[%s801_s2 + $0x78] sm:$0xff] }
  0x14   :  { %518 = vmatmul.mubr.msk.f32.gmra.mrb[8].mxu0 %vm134_vm0, %v30_v18  ;;  %v345_v34 = vld [vmem:[%s803_s4] sm:$0xff] }
  0x15   :  { %520 = vmatprep.mubr.msk.f32.mxu0 %vm134_vm0, %v31_v20  ;;  %96 = vperm.xlu0 %593, %v46_v21  }
  0x16   :  { %101 = vperm.xlu1 %594, %v47_v23  }
  0x18   :  { %521 = vmatmul.mubr.msk.f32.gmra.mrb[10].mxu0 %vm134_vm0, %v32_v22 }
  0x19   :  { %523 = vmatprep.mubr.msk.f32.mxu0 %vm134_vm0, %v33_v24  ;;  %106 = vperm.xlu0 %593, %v48_v25  }
  0x1a   :  { %111 = vperm.xlu1 %594, %v49_v27  }
  0x1c   :  { %524 = vmatmul.mubr.msk.f32.gmra.mrb[12].mxu0 %vm134_vm0, %v34_v26 }
  0x1d   :  { %526 = vmatprep.mubr.msk.f32.mxu0 %vm134_vm0, %v35_v28  ;;  %116 = vperm.xlu0 %593, %v50_v29  }
  0x1e   :  { %121 = vperm.xlu1 %594, %v51_v31  }
  0x20   :  { %527 = vmatmul.mubr.msk.f32.gmra.mrb[14].mxu0 %vm134_vm0, %v36_v30 }
  0x21   :  { %126 = vperm.xlu0 %593, %v52_v32  }
  0x22   :  { %131 = vperm.xlu1 %594, %v53_v33  }
  0x25   :  { %348 = vperm.xlu0 %593, %v345_v34  }
  0x83   :  { %v67_v37 = vpop.permute.xlu1 %66 }
  0x84   :  { %v57_v38 = vpop.permute.xlu0 %56 }
  0x87   :  { %v72_v39 = vpop.permute.xlu1 %71 }
  0x88   :  { %v62_v40 = vpop.permute.xlu0 %61 }
  0x8c   :  { %v77_v42 = vpop.permute.xlu0 %76 }
  0x8d   :  { %v82_v41 = vpop.permute.xlu1 %81 }
  0x90   :  { %v87_v51 = vpop.permute.xlu0 %86 }
  0x91   :  { %v92_v48 = vpop.permute.xlu1 %91 }
  0x94   :  { %v97_v0 = vpop.permute.xlu0 %96 }
  0x95   :  { %v102_v61 = vpop.permute.xlu1 %101 }
  0x98   :  { %v107_v12 = vpop.permute.xlu0 %106 }
  0x99   :  { %v112_v9 = vpop.permute.xlu1 %111 }
  0x9c   :  { %v117_v25 = vpop.permute.xlu0 %116 }
  0x9d   :  { %v122_v22 = vpop.permute.xlu1 %121 }
  0xa1   :  { %v132_v34 = vpop.permute.xlu1 %131 }
  0xd7   :  { %v507_v43 = vpop.f32.mrb[0].mxu0 }
  0xd8   :  { %v255_v44 = vadd.f32 %v507_v43, %v62_v40  ;;  %v249_v45 = vpop.f32.mrb[1].mxu0 }
  0xd9   :  { %v250_v46 = vadd.f32 %v249_v45, %v57_v38  ;;  %v127_v38 = vpop.permute.xlu0 %126 }
  0xda   :  { %v329_v47 = vmax.f32 %v255_v44, 0.0 }
  0xdb   :  { %v328_v49 = vmax.f32 %v250_v46, 0.0  ;;  %v510_v50 = vpop.f32.mrb[2].mxu0  ;;  %v344_v46 = vld [vmem:[%s802_s3] sm:$0xff]  ;;  %s627_s3 = smov [#allocation2]  }
  0xdc   :  { %v265_v52 = vadd.f32 %v510_v50, %v72_v39  ;;  %v259_v53 = vpop.f32.mrb[3].mxu0  ;;  %s445_s4 = sshll.u32 %s627_s3, 4  ;;  %s446_s4 = int_to_ptr.vmem [resolvable:$true] %s445_s4 }
  0xdd   :  { %v260_v54 = vadd.f32 %v259_v53, %v67_v37  ;;  %v565_v55 = vpack.c.bf16 %v329_v47, %v328_v49  ;;  %v349_v47 = vpop.permute.xlu0 %348  ;;  %s599_s8 = scalar_lea.vmem %s446_s4, 128  ;;  %p604_p1 = scmp.lt.s32.totalorder %s446_s4, %s446_s4 }
  0xde   :  { %v331_v56 = vmax.f32 %v265_v52, 0.0  ;;  %p600_p0 = scmp.ne.s32.totalorder %s446_s4, %s599_s8  ;;  %p605_p2 = scmp.lt.s32.totalorder %s599_s8, %s599_s8 }
  0xdf   :  { %v330_v57 = vmax.f32 %v260_v54, 0.0  ;;  %v513_v58 = vpop.f32.mrb[4].mxu0  ;;  %566 = vmatpush3.bf16.msra.mxu1 %v565_v55 }
  0xe0   :  { %v275_v59 = vadd.f32 %v513_v58, %v82_v41  ;;  %v269_v60 = vpop.f32.mrb[5].mxu0  ;;  %567 = vmatprep.subr.bf16.mxu1 %v624_v35  ;;  %p606_p3 = por %p605_p2, %p604_p1 }
  0xe1   :  { %v568_v62 = vpack.c.bf16 %v331_v56, %v330_v57  ;;  %v270_v63 = vadd.f32 %v269_v60, %v77_v42 }
  0xe2   :  { %v333_v1 = vmax.f32 %v275_v59, 0.0  ;;  %p607_p4 = pnand %p606_p3, %p600_p0 }
  0xe3   :  { %v332_v2 = vmax.f32 %v270_v63, 0.0  ;;  %v516_v3 = vpop.f32.mrb[6].mxu0  ;;  %569 = vmatpush3.bf16.msra.mxu1 %v568_v62 }
  0xe4   :  { %v285_v4 = vadd.f32 %v516_v3, %v92_v48  ;;  %v279_v5 = vpop.f32.mrb[7].mxu0  ;;  %570 = vmatprep.subr.bf16.mxu1 %v624_v35 }
  0xe5   :  { %v571_v6 = vpack.c.bf16 %v333_v1, %v332_v2  ;;  %v280_v7 = vadd.f32 %v279_v5, %v87_v51 }
  0xe6   :  { %v335_v8 = vmax.f32 %v285_v4, 0.0 }
  0xe7   :  { %v334_v10 = vmax.f32 %v280_v7, 0.0  ;;  %v519_v11 = vpop.f32.mrb[8].mxu0  ;;  %572 = vmatpush3.bf16.msra.mxu1 %v571_v6 }
  0xe8   :  { %v295_v13 = vadd.f32 %v519_v11, %v102_v61  ;;  %v289_v14 = vpop.f32.mrb[9].mxu0  ;;  %573 = vmatprep.subr.bf16.mxu1 %v624_v35 }
  0xe9   :  { %v574_v15 = vpack.c.bf16 %v335_v8, %v334_v10  ;;  %v290_v16 = vadd.f32 %v289_v14, %v97_v0 }
  0xea   :  { %v337_v17 = vmax.f32 %v295_v13, 0.0 }
  0xeb   :  { %v336_v18 = vmax.f32 %v290_v16, 0.0  ;;  %v522_v19 = vpop.f32.mrb[10].mxu0  ;;  %575 = vmatpush3.bf16.msra.mxu1 %v574_v15 }
  0xec   :  { %v305_v20 = vadd.f32 %v522_v19, %v112_v9  ;;  %v299_v21 = vpop.f32.mrb[11].mxu0  ;;  %576 = vmatprep.subr.bf16.mxu1 %v624_v35 }
  0xed   :  { %v577_v23 = vpack.c.bf16 %v337_v17, %v336_v18  ;;  %v300_v24 = vadd.f32 %v299_v21, %v107_v12 }
  0xee   :  { %v339_v26 = vmax.f32 %v305_v20, 0.0 }
  0xef   :  { %v338_v27 = vmax.f32 %v300_v24, 0.0  ;;  %v525_v28 = vpop.f32.mrb[12].mxu0  ;;  %578 = vmatpush3.bf16.msra.mxu1 %v577_v23 }
  0xf0   :  { %v315_v29 = vadd.f32 %v525_v28, %v122_v22  ;;  %v309_v30 = vpop.f32.mrb[13].mxu0  ;;  %579 = vmatprep.subr.bf16.mxu1 %v624_v35 }
  0xf1   :  { %v580_v31 = vpack.c.bf16 %v339_v26, %v338_v27  ;;  %v310_v32 = vadd.f32 %v309_v30, %v117_v25 }
  0xf2   :  { %v341_v33 = vmax.f32 %v315_v29, 0.0 }
  0xf3   :  { %v340_v36 = vmax.f32 %v310_v32, 0.0  ;;  %v528_v37 = vpop.f32.mrb[14].mxu0  ;;  %581 = vmatpush3.bf16.msra.mxu1 %v580_v31 }
  0xf4   :  { %v325_v39 = vadd.f32 %v528_v37, %v132_v34  ;;  %v319_v40 = vpop.f32.mrb[15].mxu0  ;;  %582 = vmatprep.subr.bf16.mxu1 %v624_v35 }
  0xf5   :  { %v583_v41 = vpack.c.bf16 %v341_v33, %v340_v36  ;;  %v320_v42 = vadd.f32 %v319_v40, %v127_v38 }
  0xf6   :  { %v343_v43 = vmax.f32 %v325_v39, 0.0 }
  0xf7   :  { %v342_v44 = vmax.f32 %v320_v42, 0.0  ;;  %584 = vmatpush3.bf16.msra.mxu1 %v583_v41 }
  0xf8   :  { %585 = vmatprep.subr.bf16.mxu1 %v624_v35 }
  0xf9   :  { %v586_v45 = vpack.c.bf16 %v343_v43, %v342_v44 }
  0xfb   :  { %587 = vmatpush3.bf16.msra.mxu1 %v586_v45 }
  0xfe   :  { %562 = vmatmul.mubr.f32.vlgmr.msra.gmra.mrb[0].mxu1 %v344_v46 }
 0x1d1   :  { %v417_v48 = vpop.f32.mrb[0].mxu1 }
 0x1d2   :  { %v418_v49 = vadd.f32 %v417_v48, %v349_v47  ;;  %v563_v50 = vpop.f32.mrb[1].mxu1 }
 0x1d4   :  { %v421_v51 = vrot.slane %v418_v49, 4 }
 0x1d6   :  { %v422_v52 = vmax.f32 %v418_v49, %v421_v51 }
 0x1d8   :  { %v423_v53 = vrot.slane %v422_v52, 2 }
 0x1da   :  { %v424_v54 = vmax.f32 %v422_v52, %v423_v53 }
 0x1dc   :  { %v425_v55 = vrot.slane %v424_v54, 1 }
 0x1de   :  { %v426_v56 = vmax.f32 %v424_v54, %v425_v55 }
 0x1e0   :  { %v427_v57 = vsub.f32 %v418_v49, %v426_v56 }
 0x1e2   :  { %v428_v58 = vmul.f32 1.442695, %v427_v57 }
 0x1e4   :  { %595 = vpow2.f32 %v428_v58 }
 0x1ee   :  { %v596_v35 = vpop.eup %595 }
 0x1ef   :  { %v430_v59 = vrot.slane %v596_v35, 4 }
 0x1f1   :  { %v431_v60 = vadd.f32 %v596_v35, %v430_v59 }
 0x1f3   :  { %v432_v61 = vrot.slane %v431_v60, 2 }
 0x1f5   :  { %v433_v62 = vadd.f32 %v432_v61, %v431_v60 }
 0x1f7   :  { %v434_v63 = vrot.slane %v433_v62, 1 }
 0x1f9   :  { %v435_v0 = vadd.f32 %v434_v63, %v433_v62 }
 0x1fb   :  { %597 = vrcp.f32 %v435_v0 }
 0x205   :  { %v598_v1 = vpop.eup %597 }
 0x206   :  { %v437_v2 = vmul.f32 %v598_v1, %v596_v35 }
 0x208   :  { %438 = vst [vmem:[#allocation2] sm:$0xff] %v437_v2 }
 0x209   :  { %610 = shalt.err (!%p607_p4)
}
 0x20a   :  { %s611_s11 = scalar_lea.hbm %s804_s5, 128 }
 0x20b   :  { %p612_p5 = scmp.ne.s32.totalorder %s804_s5, %s611_s11  ;;  %p615_p6 = scmp.lt.u32.totalorder %s611_s11, %s804_s5 }
 0x20d   :  { %p617_p7 = pnand %p615_p6, %p612_p5 }
 0x20f   :  { %620 = shalt.err (!%p617_p7)
}
 0x210   :  { %448 = dma.vmem_to_hbm [thread:$0]  %s446_s4, 128, %s804_s5, [#allocation3]  }
 0x211   :  { %621 = dma.done.wait [#allocation3], 128  }
 0x212   :  { %622 = vsyncadd [#allocation3], 4294967168 }
 0x213   :  { %452 = vsyncpa [#allocation3], 1 }

</bundles_post_ra>
